<compile_context>
chip_gen: v7x
topology: tpu7x:2x2x1
jax: 0.10.0
libtpu: 0.0.40
codegen_flags: <defaults>
</compile_context>

<pallas_src>
import functools

import jax
import jax.numpy as jnp
from jax.experimental import pallas as pl
from jax.experimental.pallas import tpu as pltpu


def _round_up(x: int, m: int) -> int:
    return ((x + m - 1) // m) * m


def _global_mean_pool_kernel(seg_ref, x_ref, o_ref, sum_acc, cnt_acc):
    # Grid = (f_tiles, n_tiles); the node/reduction axis is grid axis 1 (last).
    k = pl.program_id(1)

    @pl.when(k == 0)
    def _init():
        sum_acc[...] = jnp.zeros_like(sum_acc)
        cnt_acc[...] = jnp.zeros_like(cnt_acc)

    seg = seg_ref[...]                     # (1, TN) int32, padded nodes = -1
    x = x_ref[...]                         # (TN, TF) native dtype (no f32 upcast)
    b_pad = sum_acc.shape[0]
    tn = x.shape[0]

    # (B_pad, TN) one-hot segment membership tile; 0/1 are exact in any dtype.
    graph_ids = jax.lax.broadcasted_iota(jnp.int32, (b_pad, tn), 0)
    onehot = (graph_ids == seg).astype(x.dtype)

    # Per-graph feature sums and per-graph node counts, both on the MXU,
    # both accumulated in f32.  Counts are kept lane-dense as (B_pad, 128).
    sum_acc[...] += jnp.dot(onehot, x, preferred_element_type=jnp.float32)
    cnt_acc[...] += jnp.dot(onehot, jnp.ones((tn, 128), x.dtype),
                            preferred_element_type=jnp.float32)

    @pl.when(k == pl.num_programs(1) - 1)
    def _finalize():
        counts = jnp.maximum(cnt_acc[...], 1.0)            # empty graphs -> 0
        inv = pl.reciprocal(counts, approx=True)            # EUP, off VALU path
        o_ref[...] = (sum_acc[...] * inv[:, 0:1]).astype(o_ref.dtype)


@functools.partial(jax.jit, static_argnames=("num_graphs", "tile_n", "tile_f"))
def global_mean_pool(x, batch, num_graphs, *, tile_n=256, tile_f=512):
    """Pallas equivalent of torch_geometric.nn.global_mean_pool(x, batch)."""
    n_nodes, feat = x.shape

    # Hardware-aligned padded shapes: B -> x8 (sublanes), F -> x128 (lanes),
    # N -> multiple of the node tile (padded nodes carry batch id -1).
    b_pad = _round_up(max(num_graphs, 1), 8)
    f_pad = _round_up(feat, 128)
    tile_f = min(tile_f, f_pad)
    n_pad = _round_up(n_nodes, tile_n)

    x_p = jnp.pad(x, ((0, n_pad - n_nodes), (0, f_pad - feat)))
    seg = jnp.pad(batch.astype(jnp.int32), (0, n_pad - n_nodes),
                  constant_values=-1).reshape(1, n_pad)

    grid = (f_pad // tile_f, n_pad // tile_n)

    out = pl.pallas_call(
        _global_mean_pool_kernel,
        out_shape=jax.ShapeDtypeStruct((b_pad, f_pad), x.dtype),
        grid=grid,
        in_specs=[
            pl.BlockSpec((1, tile_n), lambda fi, ki: (0, ki)),        # batch ids
            pl.BlockSpec((tile_n, tile_f), lambda fi, ki: (ki, fi)),  # x tile
        ],
        out_specs=pl.BlockSpec((b_pad, tile_f), lambda fi, ki: (0, fi)),
        scratch_shapes=[
            pltpu.VMEM((b_pad, tile_f), jnp.float32),   # per-graph feature sums
            pltpu.VMEM((b_pad, 128), jnp.float32),      # per-graph counts (lane-dense)
        ],
        compiler_params=pltpu.CompilerParams(
            dimension_semantics=("parallel", "arbitrary"),
            vmem_limit_bytes=32 << 20,
        ),
    )(seg, x_p)

    return out[:num_graphs, :feat]


if __name__ == "__main__":
    key = jax.random.PRNGKey(0)
    n_nodes, feat, num_graphs = 8, 32, 4

    x = jax.random.normal(key, (n_nodes, feat), dtype=jnp.float32)
    # Graph 2 is intentionally empty (mean should be 0 for that row).
    batch = jnp.array([0, 0, 0, 1, 1, 3, 3, 3], dtype=jnp.int32)

    out = global_mean_pool(x, batch, num_graphs)
    out = jax.block_until_ready(out)

    # Plain-JAX reference: one-hot segment mean.
    onehot_ref = (batch[None, :] == jnp.arange(num_graphs)[:, None]).astype(jnp.float32)
    ref_sum = onehot_ref @ x
    ref_cnt = jnp.maximum(onehot_ref.sum(axis=1, keepdims=True), 1.0)
    ref = ref_sum / ref_cnt

    assert out.shape == (num_graphs, feat)
    assert jnp.allclose(out, ref, atol=1e-2, rtol=1e-2), (
        f"max abs err = {jnp.max(jnp.abs(out - ref))}")

    print("KERNEL_OK")
</pallas_src>

<mosaic_0001>
module attributes {stable_mosaic.version = 11 : i64} {
  func.func @_global_mean_pool_kernel(%arg0: i32, %arg1: i32, %arg2: memref<1x256xi32, #tpu.memory_space<vmem>>, %arg3: memref<256x128xf32, #tpu.memory_space<vmem>>, %arg4: memref<8x128xf32, #tpu.memory_space<vmem>>, %arg5: memref<8x128xf32, #tpu.memory_space<vmem>>, %arg6: memref<8x128xf32, #tpu.memory_space<vmem>>) attributes {dimension_semantics = [#tpu.dimension_semantics<parallel>, #tpu.dimension_semantics<arbitrary>], iteration_bounds = array<i64: 1, 1>, scalar_prefetch = 0 : i64, scratch_operands = 2 : i64, tpu.core_type = #tpu.core_type<tc>, window_params = [{transform_indices = @transform_0, window_bounds = array<i64: 1, 256>}, {transform_indices = @transform_1, window_bounds = array<i64: 256, 128>}, {transform_indices = @transform_2, window_bounds = array<i64: 8, 128>}]} {
    %c0_i32 = arith.constant 0 : i32
    %0 = arith.cmpi eq, %arg1, %c0_i32 : i32
    %1 = arith.extui %0 : i1 to i32
    %c0_i32_0 = arith.constant 0 : i32
    %2 = arith.cmpi ne, %1, %c0_i32_0 : i32
    scf.if %2 {
      %cst_16 = arith.constant 0.000000e+00 : f32
      %22 = vector.broadcast %cst_16 : f32 to vector<8x128xf32>
      %c0_17 = arith.constant 0 : index
      %c0_18 = arith.constant 0 : index
      %23 = vector.load %arg5[%c0_17, %c0_18] : memref<8x128xf32, #tpu.memory_space<vmem>>, vector<8x128xf32>
      tpu.vector_store %arg5[%c0_17, %c0_18], %22 {strides = array<i32>} : memref<8x128xf32, #tpu.memory_space<vmem>>, vector<8x128xf32>,
      %cst_19 = arith.constant 0.000000e+00 : f32
      %24 = vector.broadcast %cst_19 : f32 to vector<8x128xf32>
      %c0_20 = arith.constant 0 : index
      %c0_21 = arith.constant 0 : index
      %25 = vector.load %arg6[%c0_20, %c0_21] : memref<8x128xf32, #tpu.memory_space<vmem>>, vector<8x128xf32>
      tpu.vector_store %arg6[%c0_20, %c0_21], %24 {strides = array<i32>} : memref<8x128xf32, #tpu.memory_space<vmem>>, vector<8x128xf32>,
    } else {
    }
    %c0 = arith.constant 0 : index
    %c0_1 = arith.constant 0 : index
    %3 = vector.load %arg2[%c0, %c0_1] : memref<1x256xi32, #tpu.memory_space<vmem>>, vector<1x256xi32>
    %c0_2 = arith.constant 0 : index
    %c0_3 = arith.constant 0 : index
    %4 = vector.load %arg3[%c0_2, %c0_3] : memref<256x128xf32, #tpu.memory_space<vmem>>, vector<256x128xf32>
    %5 = tpu.iota {dimensions = array<i32: 0>} : vector<8x256xi32>
    %6 = vector.broadcast %3 : vector<1x256xi32> to vector<8x256xi32>
    %7 = arith.cmpi eq, %5, %6 : vector<8x256xi32>
    %8 = arith.extui %7 : vector<8x256xi1> to vector<8x256xi32>
    %9 = arith.sitofp %8 : vector<8x256xi32> to vector<8x256xf32>
    %c0_4 = arith.constant 0 : index
    %c0_5 = arith.constant 0 : index
    %10 = vector.load %arg5[%c0_4, %c0_5] : memref<8x128xf32, #tpu.memory_space<vmem>>, vector<8x128xf32>
    %cst = arith.constant dense<0.000000e+00> : vector<8x128xf32>
    %11 = tpu.matmul %9, %4, %cst {dimension_numbers = #tpu.dot_dimension_numbers<[1], [0], [0], [1], [0, 0, 1, 1], [], []>} : vector<8x256xf32>, vector<256x128xf32>, vector<8x128xf32> -> vector<8x128xf32>
    %12 = arith.addf %10, %11 : vector<8x128xf32>
    %c0_6 = arith.constant 0 : index
    %c0_7 = arith.constant 0 : index
    %13 = vector.load %arg5[%c0_6, %c0_7] : memref<8x128xf32, #tpu.memory_space<vmem>>, vector<8x128xf32>
    tpu.vector_store %arg5[%c0_6, %c0_7], %12 {strides = array<i32>} : memref<8x128xf32, #tpu.memory_space<vmem>>, vector<8x128xf32>,
    %c0_8 = arith.constant 0 : index
    %c0_9 = arith.constant 0 : index
    %14 = vector.load %arg6[%c0_8, %c0_9] : memref<8x128xf32, #tpu.memory_space<vmem>>, vector<8x128xf32>
    %cst_10 = arith.constant 1.000000e+00 : f32
    %15 = vector.broadcast %cst_10 : f32 to vector<256x128xf32>
    %cst_11 = arith.constant dense<0.000000e+00> : vector<8x128xf32>
    %16 = tpu.matmul %9, %15, %cst_11 {dimension_numbers = #tpu.dot_dimension_numbers<[1], [0], [0], [1], [0, 0, 1, 1], [], []>} : vector<8x256xf32>, vector<256x128xf32>, vector<8x128xf32> -> vector<8x128xf32>
    %17 = arith.addf %14, %16 : vector<8x128xf32>
    %c0_12 = arith.constant 0 : index
    %c0_13 = arith.constant 0 : index
    %18 = vector.load %arg6[%c0_12, %c0_13] : memref<8x128xf32, #tpu.memory_space<vmem>>, vector<8x128xf32>
    tpu.vector_store %arg6[%c0_12, %c0_13], %17 {strides = array<i32>} : memref<8x128xf32, #tpu.memory_space<vmem>>, vector<8x128xf32>,
    %c0_i32_14 = arith.constant 0 : i32
    %19 = arith.cmpi eq, %arg1, %c0_i32_14 : i32
    %20 = arith.extui %19 : i1 to i32
    %c0_i32_15 = arith.constant 0 : i32
    %21 = arith.cmpi ne, %20, %c0_i32_15 : i32
    scf.if %21 {
      %c0_16 = arith.constant 0 : index
      %c0_17 = arith.constant 0 : index
      %22 = vector.load %arg6[%c0_16, %c0_17] : memref<8x128xf32, #tpu.memory_space<vmem>>, vector<8x128xf32>
      %cst_18 = arith.constant 1.000000e+00 : f32
      %23 = vector.broadcast %cst_18 : f32 to vector<8x128xf32>
      %24 = arith.maximumf %22, %23 : vector<8x128xf32>
      %25 = tpu.reciprocal %24 {approx = true} : vector<8x128xf32> -> vector<8x128xf32>
      %c0_19 = arith.constant 0 : index
      %c0_20 = arith.constant 0 : index
      %26 = vector.load %arg5[%c0_19, %c0_20] : memref<8x128xf32, #tpu.memory_space<vmem>>, vector<8x128xf32>
      %27 = vector.extract_strided_slice %25 {offsets = [0, 0], sizes = [8, 1], strides = [1, 1]} : vector<8x128xf32> to vector<8x1xf32>
      %28 = vector.broadcast %27 : vector<8x1xf32> to vector<8x128xf32>
      %29 = arith.mulf %26, %28 : vector<8x128xf32>
      %c0_21 = arith.constant 0 : index
      %c0_22 = arith.constant 0 : index
      %30 = vector.load %arg4[%c0_21, %c0_22] : memref<8x128xf32, #tpu.memory_space<vmem>>, vector<8x128xf32>
      tpu.vector_store %arg4[%c0_21, %c0_22], %29 {strides = array<i32>} : memref<8x128xf32, #tpu.memory_space<vmem>>, vector<8x128xf32>,
    } else {
    }
    return
  }
  func.func @transform_0(%arg0: i32, %arg1: i32) -> (i32, i32) {
    %c0_i32 = arith.constant 0 : i32
    %c0_i32_0 = arith.constant 0 : i32
    return %c0_i32, %arg1 : i32, i32
  }
  func.func @transform_1(%arg0: i32, %arg1: i32) -> (i32, i32) {
    %c0_i32 = arith.constant 0 : i32
    return %arg1, %arg0 : i32, i32
  }
  func.func @transform_2(%arg0: i32, %arg1: i32) -> (i32, i32) {
    %c0_i32 = arith.constant 0 : i32
    %c0_i32_0 = arith.constant 0 : i32
    return %c0_i32, %arg0 : i32, i32
  }
}

</mosaic_0001>

<bundles_post_ra>
// kernel: global_mean_pool.1
= control target key start
LH: loop header
LB: loop body
LE: loop exit
PB: predicated region body
PF: predicated region fallthrough
CT: control target
= control target key end

     0   :  { %v50_v0 = vlaneseq  ;;  %v360_v1 = vmov 1.0|1.0   ;;  %v361_v25 = vmov 1.0   ;;  %v362_v57 = vmov 0   ;;  %s506_s0 = inlined_call_operand.vmem [shape: s32[1,256], index: 0, kind: input, shape index: {}]   ;;  %s507_s1 = inlined_call_operand.vmem [shape: f32[256,128], index: 1, kind: input, shape index: {}]   ;;  %s508_s2 = inlined_call_operand.vmem [shape: f32[8,128], index: 2, kind: output, shape index: {}]  }
   0x1   :  { %338 = vmatprep.subr.bf16.mxu1 %v360_v1  ;;  %v382_v2 = vld [vmem:[%s506_s0] sm:$0x3]  ;;  %v35_v4 = vld [vmem:[%s507_s1 + $0x88] sm:$0xff]  ;;  %v36_v9 = vld [vmem:[%s507_s1 + $0x90] sm:$0xff]  ;;  %357 = vset.pattern.permute.xlu0 %v362_v57 }
   0x2   :  { %v34_v3 = vld [vmem:[%s507_s1 + $0x80] sm:$0xff]  ;;  %339 = vmatpush3.bf16.msra.mxu1 %v360_v1  ;;  %v391_v5 = vshrl.u32 %v50_v0, 7  ;;  %v19_v8 = vld [vmem:[%s507_s1 + $0x8] sm:$0xff]  ;;  %v37_v11 = vld [vmem:[%s507_s1 + $0x98] sm:$0xff] }
   0x3   :  { %v306_v6 = vpack.c.bf16 %v35_v4, %v34_v3  ;;  %v18_v7 = vld [vmem:[%s507_s1] sm:$0xff]  ;;  %340 = vmatprep.subr.bf16.mxu1 %v360_v1  ;;  %v20_v12 = vld [vmem:[%s507_s1 + $0x10] sm:$0xff]  ;;  %v21_v13 = vld [vmem:[%s507_s1 + $0x18] sm:$0xff]  ;;  %v310_v15 = vpack.c.bf16 %v37_v11, %v36_v9 }
   0x4   :  { %v308_v10 = vpack.c.bf16 %v19_v8, %v18_v7  ;;  %v58_v14 = vsub.s32 1, %v391_v5  ;;  %v38_v16 = vld [vmem:[%s507_s1 + $0xa0] sm:$0xff]  ;;  %v39_v17 = vld [vmem:[%s507_s1 + $0xa8] sm:$0xff]  ;;  %v312_v18 = vpack.c.bf16 %v21_v13, %v20_v12  ;;  %v40_v23 = vld [vmem:[%s507_s1 + $0xb0] sm:$0xff]  ;;  %v54_v45 = vsub.s32 0, %v391_v5 }
   0x5   :  { %307 = vmatprep.subr.bf16.mxu0 %v306_v6  ;;  %v314_v20 = vpack.c.bf16 %v39_v17, %v38_v16  ;;  %v22_v21 = vld [vmem:[%s507_s1 + $0x20] sm:$0xff]  ;;  %v23_v22 = vld [vmem:[%s507_s1 + $0x28] sm:$0xff]  ;;  %v41_v24 = vld [vmem:[%s507_s1 + $0xb8] sm:$0xff] }
   0x6   :  { %309 = vmatpush3.bf16.msra.mxu0 %v308_v10  ;;  %341 = vmatpush3.bf16.msra.mxu1 %v360_v1  ;;  %v59_v19 = vrot.slane %v382_v2, %v58_v14  ;;  %v316_v26 = vpack.c.bf16 %v23_v22, %v22_v21  ;;  %v318_v27 = vpack.c.bf16 %v41_v24, %v40_v23  ;;  %v24_v28 = vld [vmem:[%s507_s1 + $0x30] sm:$0xff]  ;;  %v25_v29 = vld [vmem:[%s507_s1 + $0x38] sm:$0xff]  ;;  %v42_v30 = vld [vmem:[%s507_s1 + $0xc0] sm:$0xff] }
   0x7   :  { %311 = vmatprep.subr.bf16.mxu0 %v310_v15  ;;  %342 = vmatprep.subr.bf16.mxu1 %v360_v1  ;;  %v43_v31 = vld [vmem:[%s507_s1 + $0xc8] sm:$0xff]  ;;  %v320_v32 = vpack.c.bf16 %v25_v29, %v24_v28  ;;  %v26_v34 = vld [vmem:[%s507_s1 + $0x40] sm:$0xff]  ;;  %v44_v36 = vld [vmem:[%s507_s1 + $0xd0] sm:$0xff]  ;;  %v55_v52 = vrot.slane %v382_v2, %v54_v45 }
   0x8   :  { %vm61_vm0 = vcmp.eq.s32.totalorder %v391_v5, %v59_v19  ;;  %v322_v33 = vpack.c.bf16 %v43_v31, %v42_v30  ;;  %v27_v35 = vld [vmem:[%s507_s1 + $0x48] sm:$0xff]  ;;  %v45_v37 = vld [vmem:[%s507_s1 + $0xd8] sm:$0xff]  ;;  %v28_v40 = vld [vmem:[%s507_s1 + $0x50] sm:$0xff] }
   0x9   :  { %234 = vmatprep.mubr.msk.f32.mxu1 %vm61_vm0, %v361_v25  ;;  %232 = vmatprep.mubr.msk.f32.mxu0 %vm61_vm0, %v361_v25  ;;  %v324_v38 = vpack.c.bf16 %v27_v35, %v26_v34  ;;  %v326_v39 = vpack.c.bf16 %v45_v37, %v44_v36  ;;  %v29_v41 = vld [vmem:[%s507_s1 + $0x58] sm:$0xff]  ;;  %v46_v42 = vld [vmem:[%s507_s1 + $0xe0] sm:$0xff]  ;;  %v47_v43 = vld [vmem:[%s507_s1 + $0xe8] sm:$0xff]  ;;  %vm60_vm1 = vcmp.eq.s32.totalorder %v391_v5, %v55_v52 }
   0xa   :  { %313 = vmatpush3.bf16.msra.mxu0 %v312_v18  ;;  %343 = vmatpush3.bf16.msra.mxu1 %v360_v1  ;;  %v328_v44 = vpack.c.bf16 %v29_v41, %v28_v40  ;;  %v330_v46 = vpack.c.bf16 %v47_v43, %v46_v42  ;;  %v30_v47 = vld [vmem:[%s507_s1 + $0x60] sm:$0xff]  ;;  %v31_v48 = vld [vmem:[%s507_s1 + $0x68] sm:$0xff]  ;;  %v48_v49 = vld [vmem:[%s507_s1 + $0xf0] sm:$0xff] }
   0xb   :  { %315 = vmatprep.subr.bf16.mxu0 %v314_v20  ;;  %344 = vmatprep.subr.bf16.mxu1 %v360_v1  ;;  %v49_v50 = vld [vmem:[%s507_s1 + $0xf8] sm:$0xff]  ;;  %v332_v51 = vpack.c.bf16 %v31_v48, %v30_v47  ;;  %v32_v54 = vld [vmem:[%s507_s1 + $0x70] sm:$0xff] }
   0xc   :  { %v334_v53 = vpack.c.bf16 %v49_v50, %v48_v49  ;;  %v33_v55 = vld [vmem:[%s507_s1 + $0x78] sm:$0xff] }
   0xd   :  { %v336_v56 = vpack.c.bf16 %v33_v55, %v32_v54 }
   0xe   :  { %317 = vmatpush3.bf16.msra.mxu0 %v316_v26  ;;  %345 = vmatpush3.bf16.msra.mxu1 %v360_v1 }
   0xf   :  { %319 = vmatprep.subr.bf16.mxu0 %v318_v27  ;;  %346 = vmatprep.subr.bf16.mxu1 %v360_v1 }
  0x12   :  { %321 = vmatpush3.bf16.msra.mxu0 %v320_v32  ;;  %347 = vmatpush3.bf16.msra.mxu1 %v360_v1 }
  0x13   :  { %323 = vmatprep.subr.bf16.mxu0 %v322_v33  ;;  %348 = vmatprep.subr.bf16.mxu1 %v360_v1 }
  0x16   :  { %325 = vmatpush3.bf16.msra.mxu0 %v324_v38  ;;  %349 = vmatpush3.bf16.msra.mxu1 %v360_v1 }
  0x17   :  { %327 = vmatprep.subr.bf16.mxu0 %v326_v39  ;;  %350 = vmatprep.subr.bf16.mxu1 %v360_v1 }
  0x1a   :  { %329 = vmatpush3.bf16.msra.mxu0 %v328_v44  ;;  %351 = vmatpush3.bf16.msra.mxu1 %v360_v1 }
  0x1b   :  { %331 = vmatprep.subr.bf16.mxu0 %v330_v46  ;;  %352 = vmatprep.subr.bf16.mxu1 %v360_v1 }
  0x1e   :  { %333 = vmatpush3.bf16.msra.mxu0 %v332_v51  ;;  %353 = vmatpush3.bf16.msra.mxu1 %v360_v1 }
  0x1f   :  { %335 = vmatprep.subr.bf16.mxu0 %v334_v53 }
  0x21   :  { %235 = vmatmul.mubr.msk.f32.vlgmr.msra.gmra.mrb[0].mxu1 %vm60_vm1, %v361_v25 }
  0x22   :  { %337 = vmatpush3.bf16.msra.mxu0 %v336_v56 }
  0x25   :  { %233 = vmatmul.mubr.msk.f32.vlgmr.msra.gmra.mrb[0].mxu0 %vm60_vm1, %v361_v25 }
  0xf4   :  { %v303_v58 = vpop.f32.mrb[0].mxu1 }
  0xf5   :  { %v304_v59 = vpop.f32.mrb[1].mxu1 }
  0xf6   :  { %v305_v60 = vadd.f32 %v304_v59, %v303_v58 }
  0xf8   :  { %v268_v61 = vpop.f32.mrb[0].mxu0  ;;  %v216_v62 = vmax.f32 %v305_v60, 1.0 }
  0xf9   :  { %v269_v63 = vpop.f32.mrb[1].mxu0 }
  0xfa   :  { %v270_v0 = vadd.f32 %v269_v63, %v268_v61  ;;  %358 = vrcp.f32 %v216_v62 }
 0x104   :  { %v359_v2 = vpop.eup %358 }
 0x105   :  { %221 = vperm.xlu0 %357, %v359_v2  }
 0x184   :  { %v222_v3 = vpop.permute.xlu0 %221 }
 0x185   :  { %v224_v1 = vmul.f32 %v270_v0, %v222_v3 }
 0x187   :  { %225 = vst [vmem:[%s508_s2] sm:$0xff] %v224_v1 }

</bundles_post_ra>
